<compile_context>
chip_gen: v7x
topology: tpu7x:2x2x1
jax: 0.10.0
libtpu: 0.0.40
codegen_flags: <defaults>
</compile_context>

<pallas_src>
import functools

import jax
import jax.numpy as jnp
from jax.experimental import pallas as pl
from jax.experimental.pallas import tpu as pltpu

OUT_LANES = 128               # lane-dense output slab width
ACTION_LANE = OUT_LANES - 1   # float(argmax action) lives in the last lane


# ---------------------------------------------------------------------------
# Pallas kernel: fused MLPBase + critic_linear + Categorical head + argmax
# ---------------------------------------------------------------------------
def _policy_fused_kernel(
    x_ref, w1_ref, w2_ref, wh_ref, b1_ref, b2_ref, bh_ref,   # inputs
    slab_ref,                                                # lane-dense output
    *, n_actions,
):
    x = x_ref[...]                                           # (bt, in)  bf16

    # layer 1: both towers side-by-side -> (bt, W), W lane-padded to >= 128
    h1 = jnp.tanh(
        jnp.dot(x, w1_ref[...], preferred_element_type=jnp.float32)
        + b1_ref[...])
    # layer 2: block-diagonal of the two towers -> (bt, W)
    h2 = jnp.tanh(
        jnp.dot(h1.astype(jnp.bfloat16), w2_ref[...],
                preferred_element_type=jnp.float32)
        + b2_ref[...])
    # head matmul produces the whole lane-dense output slab:
    #   col 0            = value (critic_linear on the critic half of h2)
    #   cols 1..1+A      = action logits (dist head on the actor half)
    #   cols 1+A..1+A+H  = hidden_actor (identity copy of the actor half)
    #   col 127          = (overwritten below) deterministic action
    head = (jnp.dot(h2.astype(jnp.bfloat16), wh_ref[...],
                    preferred_element_type=jnp.float32)
            + bh_ref[...])

    # deterministic action = argmax over the logit columns [1, 1+n_actions)
    col = jax.lax.broadcasted_iota(jnp.int32, head.shape, 1)
    in_logits = (col >= 1) & (col < 1 + n_actions)
    masked = jnp.where(in_logits, head, -jnp.inf)
    row_max = jnp.max(masked, axis=-1, keepdims=True)
    idx = jnp.where(in_logits & (masked == row_max), col, head.shape[-1])
    action = jnp.min(idx, axis=-1, keepdims=True) - 1        # (bt, 1) int32

    # single lane-dense store: fold float(action) into lane 127 of the slab
    # (exact for small integer actions; avoids a narrow int32 output buffer)
    slab_ref[...] = jnp.where(col == ACTION_LANE, action.astype(jnp.float32), head)


# ---------------------------------------------------------------------------
# Wrapper: one pallas_call + cheap slicing, fused in a single jit region
# ---------------------------------------------------------------------------
@functools.partial(jax.jit, static_argnames=("hidden", "n_actions", "batch_block"))
def policy_forward(x, rnn_hxs, masks, packed, *, hidden, n_actions,
                   batch_block=None):
    """Returns (value, action_logits, hidden_actor, deterministic_action, rnn_hxs)."""
    del masks  # non-recurrent base: masks unused
    batch = x.shape[0]
    x = x.astype(jnp.bfloat16)   # halve input DMA bytes; MXU is bf16-native

    w1, w2, wh = packed["w1"], packed["w2"], packed["whead"]
    b1, b2, bh = packed["b1"], packed["b2"], packed["bhead"]
    in_dim, W = w1.shape

    kernel = functools.partial(_policy_fused_kernel, n_actions=n_actions)

    cost = pl.CostEstimate(
        flops=2 * batch * (in_dim * W + W * W + W * OUT_LANES),
        transcendentals=2 * batch * W,
        bytes_accessed=(x.size * 2
                        + (w1.size + w2.size + wh.size) * 2
                        + (b1.size + b2.size + bh.size) * 4
                        + batch * OUT_LANES * 4),
    )
    out_shape = jax.ShapeDtypeStruct((batch, OUT_LANES), jnp.float32)

    if batch_block is None or batch_block >= batch:
        # Single block, no grid: whole working set is tiny and VMEM-resident.
        # (v5e/v6e: keep this form until the batch genuinely exceeds the scoped
        # VMEM budget — a grid is a serial loop on a single TensorCore.)
        vmem = pl.BlockSpec(memory_space=pltpu.MemorySpace.VMEM)
        slab = pl.pallas_call(
            kernel,
            out_shape=out_shape,
            in_specs=[vmem] * 7,
            out_specs=vmem,
            cost_estimate=cost,
        )(x, w1, w2, wh, b1, b2, bh)
    else:
        # Large-batch form (v7x: parallel axis shards rows across both
        # TensorCores).  Weights/biases use constant index maps so they stay
        # VMEM-resident instead of being re-DMA'd each grid step.
        def resident(a):
            return pl.BlockSpec(a.shape, lambda i: (0,) * a.ndim)

        slab = pl.pallas_call(
            kernel,
            out_shape=out_shape,
            grid=(pl.cdiv(batch, batch_block),),
            in_specs=[pl.BlockSpec((batch_block, in_dim), lambda i: (i, 0)),
                      resident(w1), resident(w2), resident(wh),
                      resident(b1), resident(b2), resident(bh)],
            out_specs=pl.BlockSpec((batch_block, OUT_LANES), lambda i: (i, 0)),
            compiler_params=pltpu.CompilerParams(
                dimension_semantics=("parallel",)),
            cost_estimate=cost,
        )(x, w1, w2, wh, b1, b2, bh)

    value = slab[:, 0:1]
    logits = slab[:, 1:1 + n_actions]
    hidden_actor = slab[:, 1 + n_actions:1 + n_actions + hidden]
    action = slab[:, ACTION_LANE:ACTION_LANE + 1].astype(jnp.int32)
    return value, logits, hidden_actor, action, rnn_hxs


# ---------------------------------------------------------------------------
# Parameter init (matches the PyTorch module: orthogonal weights, zero biases)
# and packing into the fused bf16 slabs used by the kernel.
# ---------------------------------------------------------------------------
def _orthogonal(key, out_dim, in_dim, gain):
    rows, cols = out_dim, in_dim
    transpose = rows < cols
    shape = (cols, rows) if transpose else (rows, cols)
    a = jax.random.normal(key, shape, dtype=jnp.float32)
    q, r = jnp.linalg.qr(a)
    d = jnp.sign(jnp.diagonal(r))
    q = q * d[None, :]
    if transpose:
        q = q.T
    return gain * q  # (out_dim, in_dim)


def make_params(key, num_inputs, hidden_size, n_actions):
    gain_tanh = float(jnp.sqrt(2.0))
    keys = jax.random.split(key, 6)

    def linear(k, in_dim, out_dim, gain):
        w = _orthogonal(k, out_dim, in_dim, gain)   # (out, in) like torch
        return w.T.astype(jnp.float32), jnp.zeros((out_dim,), jnp.float32)

    wc1, bc1 = linear(keys[0], num_inputs, hidden_size, gain_tanh)
    wc2, bc2 = linear(keys[1], hidden_size, hidden_size, gain_tanh)
    wa1, ba1 = linear(keys[2], num_inputs, hidden_size, gain_tanh)
    wa2, ba2 = linear(keys[3], hidden_size, hidden_size, gain_tanh)
    wcl, bcl = linear(keys[4], hidden_size, 1, 1.0)          # critic_linear
    wd, bd = linear(keys[5], hidden_size, n_actions, 0.01)   # Categorical head

    return dict(
        wc1=wc1, bc1=bc1, wc2=wc2, bc2=bc2, wcl=wcl, bcl=bcl,
        wa1=wa1, ba1=ba1, wa2=wa2, ba2=ba2, wd=wd, bd=bd,
    )


def pack_params(p, num_inputs, hidden, n_actions, out_lanes=OUT_LANES):
    """Packs the 12 per-layer tensors into 6 fused slabs for the kernel."""
    H = hidden
    assert 1 + n_actions + H <= out_lanes - 1, (
        "output slab too narrow (last lane is reserved for the action)")

    # fused tower width, lane-padded up to a multiple of 128 (>= 2H)
    W = max(2 * H, 128)
    W = ((W + 127) // 128) * 128

    # layer 1: [critic | actor | zero pad]
    w1 = jnp.zeros((num_inputs, W), jnp.float32)
    w1 = w1.at[:, :H].set(p["wc1"]).at[:, H:2 * H].set(p["wa1"])
    # layer 2: block-diagonal so the towers stay independent; pad lanes stay 0
    w2 = jnp.zeros((W, W), jnp.float32)
    w2 = w2.at[:H, :H].set(p["wc2"]).at[H:2 * H, H:2 * H].set(p["wa2"])

    # head: value | logits | identity-copy of hidden_actor | zero pad
    whead = jnp.zeros((W, out_lanes), jnp.float32)
    whead = whead.at[:H, 0:1].set(p["wcl"])
    whead = whead.at[H:2 * H, 1:1 + n_actions].set(p["wd"])
    whead = whead.at[H:2 * H, 1 + n_actions:1 + n_actions + H].set(
        jnp.eye(H, dtype=jnp.float32))

    b1 = jnp.zeros((1, W), jnp.float32)
    b1 = b1.at[0, :H].set(p["bc1"]).at[0, H:2 * H].set(p["ba1"])
    b2 = jnp.zeros((1, W), jnp.float32)
    b2 = b2.at[0, :H].set(p["bc2"]).at[0, H:2 * H].set(p["ba2"])
    bhead = jnp.zeros((1, out_lanes), jnp.float32)
    bhead = bhead.at[0, 0:1].set(p["bcl"]).at[0, 1:1 + n_actions].set(p["bd"])

    return dict(
        w1=w1.astype(jnp.bfloat16),       # bf16 weights: native MXU path
        w2=w2.astype(jnp.bfloat16),
        whead=whead.astype(jnp.bfloat16),
        b1=b1, b2=b2, bhead=bhead,        # biases stay f32
    )


# ---------------------------------------------------------------------------
# Pure-JAX reference of the original (unfused, f32 HIGHEST) forward
# ---------------------------------------------------------------------------
def reference_forward(x, p):
    hi = jax.lax.Precision.HIGHEST
    hc = jnp.tanh(jnp.dot(x, p["wc1"], precision=hi) + p["bc1"])
    hc = jnp.tanh(jnp.dot(hc, p["wc2"], precision=hi) + p["bc2"])
    value = jnp.dot(hc, p["wcl"], precision=hi) + p["bcl"]
    ha = jnp.tanh(jnp.dot(x, p["wa1"], precision=hi) + p["ba1"])
    ha = jnp.tanh(jnp.dot(ha, p["wa2"], precision=hi) + p["ba2"])
    logits = jnp.dot(ha, p["wd"], precision=hi) + p["bd"]
    return value, logits, ha


if __name__ == "__main__":
    key = jax.random.PRNGKey(0)
    k_x, k_p = jax.random.split(key)

    num_inputs = 16    # obs_shape = (16,)
    hidden_size = 32
    n_actions = 6      # Discrete(6)

    params = make_params(k_p, num_inputs, hidden_size, n_actions)
    packed = pack_params(params, num_inputs, hidden_size, n_actions)

    # bf16 kernel vs f32-HIGHEST reference: tolerance sized for bf16 operands
    TOL = 5e-2

    def check(batch, batch_block):
        x = jax.random.normal(jax.random.fold_in(k_x, batch),
                              (batch, num_inputs), dtype=jnp.float32)
        rnn_hxs = jnp.zeros((batch, 1), jnp.float32)   # non-recurrent: size 1
        masks = jnp.ones((batch, 1), jnp.float32)

        value, logits, hidden_actor, action, rnn_out = policy_forward(
            x, rnn_hxs, masks, packed,
            hidden=hidden_size, n_actions=n_actions, batch_block=batch_block)
        jax.block_until_ready((value, logits, hidden_actor, action, rnn_out))

        assert value.shape == (batch, 1)
        assert logits.shape == (batch, n_actions)
        assert hidden_actor.shape == (batch, hidden_size)
        assert action.shape == (batch, 1) and action.dtype == jnp.int32
        assert rnn_out.shape == rnn_hxs.shape

        v_ref, l_ref, ha_ref = reference_forward(x, params)
        assert jnp.allclose(value, v_ref, rtol=TOL, atol=TOL)
        assert jnp.allclose(logits, l_ref, rtol=TOL, atol=TOL)
        assert jnp.allclose(hidden_actor, ha_ref, rtol=TOL, atol=TOL)
        # in-kernel deterministic action must match argmax of the kernel logits
        assert jnp.array_equal(action[:, 0], jnp.argmax(logits, axis=-1))

    check(batch=8, batch_block=None)   # single-block path (v5e/v6e default)
    check(batch=16, batch_block=8)     # batch-tiled parallel path (v7x form)

    # TODO(synk): stochastic dist.sample() / log_probs / entropy stay in plain
    # JAX (RNG sampling has no reason to live inside the kernel).
    print("KERNEL_OK")
</pallas_src>

<mosaic_0001>
module attributes {stable_mosaic.version = 11 : i64} {
  func.func @_policy_fused_kernel(%arg0: memref<8x16xbf16, #tpu.memory_space<vmem>>, %arg1: memref<16x128xbf16, #tpu.memory_space<vmem>>, %arg2: memref<128x128xbf16, #tpu.memory_space<vmem>>, %arg3: memref<128x128xbf16, #tpu.memory_space<vmem>>, %arg4: memref<1x128xf32, #tpu.memory_space<vmem>>, %arg5: memref<1x128xf32, #tpu.memory_space<vmem>>, %arg6: memref<1x128xf32, #tpu.memory_space<vmem>>, %arg7: memref<8x128xf32, #tpu.memory_space<vmem>>) attributes {dimension_semantics = [], scalar_prefetch = 0 : i64, scratch_operands = 0 : i64, tpu.core_type = #tpu.core_type<tc>} {
    %c0 = arith.constant 0 : index
    %c0_0 = arith.constant 0 : index
    %0 = vector.load %arg0[%c0, %c0_0] : memref<8x16xbf16, #tpu.memory_space<vmem>>, vector<8x16xbf16>
    %c0_1 = arith.constant 0 : index
    %c0_2 = arith.constant 0 : index
    %1 = vector.load %arg1[%c0_1, %c0_2] : memref<16x128xbf16, #tpu.memory_space<vmem>>, vector<16x128xbf16>
    %cst = arith.constant dense<0.000000e+00> : vector<8x128xf32>
    %2 = tpu.matmul %0, %1, %cst {dimension_numbers = #tpu.dot_dimension_numbers<[1], [0], [0], [1], [0, 0, 1, 1], [], []>} : vector<8x16xbf16>, vector<16x128xbf16>, vector<8x128xf32> -> vector<8x128xf32>
    %c0_3 = arith.constant 0 : index
    %c0_4 = arith.constant 0 : index
    %3 = vector.load %arg4[%c0_3, %c0_4] : memref<1x128xf32, #tpu.memory_space<vmem>>, vector<1x128xf32>
    %4 = vector.broadcast %3 : vector<1x128xf32> to vector<8x128xf32>
    %5 = arith.addf %2, %4 : vector<8x128xf32>
    %6 = math.tanh %5 : vector<8x128xf32>
    %7 = arith.truncf %6 : vector<8x128xf32> to vector<8x128xbf16>
    %c0_5 = arith.constant 0 : index
    %c0_6 = arith.constant 0 : index
    %8 = vector.load %arg2[%c0_5, %c0_6] : memref<128x128xbf16, #tpu.memory_space<vmem>>, vector<128x128xbf16>
    %cst_7 = arith.constant dense<0.000000e+00> : vector<8x128xf32>
    %9 = tpu.matmul %7, %8, %cst_7 {dimension_numbers = #tpu.dot_dimension_numbers<[1], [0], [0], [1], [0, 0, 1, 1], [], []>} : vector<8x128xbf16>, vector<128x128xbf16>, vector<8x128xf32> -> vector<8x128xf32>
    %c0_8 = arith.constant 0 : index
    %c0_9 = arith.constant 0 : index
    %10 = vector.load %arg5[%c0_8, %c0_9] : memref<1x128xf32, #tpu.memory_space<vmem>>, vector<1x128xf32>
    %11 = vector.broadcast %10 : vector<1x128xf32> to vector<8x128xf32>
    %12 = arith.addf %9, %11 : vector<8x128xf32>
    %13 = math.tanh %12 : vector<8x128xf32>
    %14 = arith.truncf %13 : vector<8x128xf32> to vector<8x128xbf16>
    %c0_10 = arith.constant 0 : index
    %c0_11 = arith.constant 0 : index
    %15 = vector.load %arg3[%c0_10, %c0_11] : memref<128x128xbf16, #tpu.memory_space<vmem>>, vector<128x128xbf16>
    %cst_12 = arith.constant dense<0.000000e+00> : vector<8x128xf32>
    %16 = tpu.matmul %14, %15, %cst_12 {dimension_numbers = #tpu.dot_dimension_numbers<[1], [0], [0], [1], [0, 0, 1, 1], [], []>} : vector<8x128xbf16>, vector<128x128xbf16>, vector<8x128xf32> -> vector<8x128xf32>
    %c0_13 = arith.constant 0 : index
    %c0_14 = arith.constant 0 : index
    %17 = vector.load %arg6[%c0_13, %c0_14] : memref<1x128xf32, #tpu.memory_space<vmem>>, vector<1x128xf32>
    %18 = vector.broadcast %17 : vector<1x128xf32> to vector<8x128xf32>
    %19 = arith.addf %16, %18 : vector<8x128xf32>
    %20 = tpu.iota {dimensions = array<i32: 1>} : vector<8x128xi32>
    %c1_i32 = arith.constant 1 : i32
    %21 = vector.broadcast %c1_i32 : i32 to vector<8x128xi32>
    %22 = arith.cmpi sge, %20, %21 : vector<8x128xi32>
    %c7_i32 = arith.constant 7 : i32
    %23 = vector.broadcast %c7_i32 : i32 to vector<8x128xi32>
    %24 = arith.cmpi slt, %20, %23 : vector<8x128xi32>
    %25 = arith.andi %22, %24 : vector<8x128xi1>
    %cst_15 = arith.constant 0xFF800000 : f32
    %26 = vector.broadcast %cst_15 : f32 to vector<8x128xf32>
    %27 = arith.select %25, %19, %26 : vector<8x128xi1>, vector<8x128xf32>
    %cst_16 = arith.constant dense<0xFF800000> : vector<8xf32>
    %28 = vector.multi_reduction <maximumf>, %27, %cst_16 [1] : vector<8x128xf32> to vector<8xf32>
    %29 = vector.shape_cast %28 : vector<8xf32> to vector<8x1xf32>
    %30 = vector.broadcast %29 : vector<8x1xf32> to vector<8x128xf32>
    %31 = arith.cmpf oeq, %27, %30 : vector<8x128xf32>
    %32 = arith.andi %25, %31 : vector<8x128xi1>
    %c128_i32 = arith.constant 128 : i32
    %33 = vector.broadcast %c128_i32 : i32 to vector<8x128xi32>
    %34 = arith.select %32, %20, %33 : vector<8x128xi1>, vector<8x128xi32>
    %cst_17 = arith.constant dense<2147483647> : vector<8xi32>
    %35 = vector.multi_reduction <minsi>, %34, %cst_17 [1] : vector<8x128xi32> to vector<8xi32>
    %36 = vector.shape_cast %35 : vector<8xi32> to vector<8x1xi32>
    %c1_i32_18 = arith.constant 1 : i32
    %37 = vector.broadcast %c1_i32_18 : i32 to vector<8x1xi32>
    %38 = arith.subi %36, %37 : vector<8x1xi32>
    %c127_i32 = arith.constant 127 : i32
    %39 = vector.broadcast %c127_i32 : i32 to vector<8x128xi32>
    %40 = arith.cmpi eq, %20, %39 : vector<8x128xi32>
    %41 = arith.sitofp %38 : vector<8x1xi32> to vector<8x1xf32>
    %42 = vector.shape_cast %41 : vector<8x1xf32> to vector<8x1xf32>
    %43 = vector.broadcast %42 : vector<8x1xf32> to vector<8x128xf32>
    %44 = arith.select %40, %43, %19 : vector<8x128xi1>, vector<8x128xf32>
    %c0_19 = arith.constant 0 : index
    %c0_20 = arith.constant 0 : index
    %45 = vector.load %arg7[%c0_19, %c0_20] : memref<8x128xf32, #tpu.memory_space<vmem>>, vector<8x128xf32>
    tpu.vector_store %arg7[%c0_19, %c0_20], %44 {strides = array<i32>} : memref<8x128xf32, #tpu.memory_space<vmem>>, vector<8x128xf32>,
    return
  }
}

</mosaic_0001>

<bundles_post_ra>
// kernel: policy_forward.1
= control target key start
LH: loop header
LB: loop body
LE: loop exit
PB: predicated region body
PF: predicated region fallthrough
CT: control target
= control target key end

     0   :  { %12 = vsyncpa [#allocation3], 0  ;;  %s648_s0 = inlined_call_operand.vmem [shape: bf16[8,16], index: 0, kind: input, shape index: {}]   ;;  %s649_s1 = inlined_call_operand.vmem [shape: bf16[16,128], index: 1, kind: input, shape index: {}]   ;;  %s650_s2 = inlined_call_operand.hbm [shape: bf16[128,128], index: 2, kind: input, shape index: {}]   ;;  %s651_s3 = inlined_call_operand.hbm [shape: bf16[128,128], index: 3, kind: input, shape index: {}]   ;;  %s652_s4 = inlined_call_operand.vmem [shape: f32[1,128], index: 4, kind: input, shape index: {}]   ;;  %s653_s5 = inlined_call_operand.vmem [shape: f32[1,128], index: 5, kind: input, shape index: {}]   ;;  %s654_s6 = inlined_call_operand.vmem [shape: f32[1,128], index: 6, kind: input, shape index: {}]   ;;  %s655_s7 = inlined_call_operand.vmem [shape: f32[8,128], index: 7, kind: output, shape index: {}]  }
   0x1   :  { %13 = vsyncpa [#allocation5], 0  ;;  %s540_s24 = smov [#allocation2]   ;;  %s492_s28 = scalar_lea.hbm %s650_s2, 1024 }
   0x2   :  { %s23_s25 = sshll.u32 %s540_s24, 4  ;;  %p493_p0 = scmp.ne.s32.totalorder %s650_s2, %s492_s28  ;;  %s24_s25 = int_to_ptr.vmem [resolvable:$true] %s23_s25 }
   0x3   :  { %p496_p1 = scmp.lt.u32.totalorder %s492_s28, %s650_s2 }
   0x5   :  { %p498_p2 = pnand %p496_p1, %p493_p0 }
   0x7   :  { %501 = shalt.err (!%p498_p2)
}
   0x8   :  { %s502_s10 = scalar_lea.vmem %s24_s25, 1024  ;;  %p507_p4 = scmp.lt.s32.totalorder %s24_s25, %s24_s25 }
   0x9   :  { %p503_p3 = scmp.ne.s32.totalorder %s24_s25, %s502_s10  ;;  %p508_p5 = scmp.lt.s32.totalorder %s502_s10, %s502_s10 }
   0xb   :  { %p509_p6 = por %p508_p5, %p507_p4 }
   0xd   :  { %p510_p7 = pnand %p509_p6, %p503_p3 }
   0xf   :  { %513 = shalt.err (!%p510_p7)
}
  0x10   :  { %s541_s11 = smov 64   ;;  %s542_s12 = smov 4  }
  0x11   :  { %29 = dma.hbm_to_vmem [thread:$0]  %s650_s2, 1024, %s24_s25, [#allocation3], %s541_s11, %s541_s11, %s542_s12  }
  0x12   :  { %s543_s15 = smov [#allocation4]   ;;  %s514_s19 = scalar_lea.hbm %s651_s3, 1024 }
  0x13   :  { %s35_s16 = sshll.u32 %s543_s15, 4  ;;  %p515_p8 = scmp.ne.s32.totalorder %s651_s3, %s514_s19  ;;  %s36_s16 = int_to_ptr.vmem [resolvable:$true] %s35_s16 }
  0x14   :  { %p518_p9 = scmp.lt.u32.totalorder %s514_s19, %s651_s3 }
  0x16   :  { %p520_p10 = pnand %p518_p9, %p515_p8 }
  0x18   :  { %523 = shalt.err (!%p520_p10)
}
  0x19   :  { %s524_s24 = scalar_lea.vmem %s36_s16, 1024  ;;  %p529_p12 = scmp.lt.s32.totalorder %s36_s16, %s36_s16 }
  0x1a   :  { %p525_p11 = scmp.ne.s32.totalorder %s36_s16, %s524_s24  ;;  %p530_p13 = scmp.lt.s32.totalorder %s524_s24, %s524_s24 }
  0x1c   :  { %p531_p0 = por %p530_p13, %p529_p12 }
  0x1e   :  { %p532_p1 = pnand %p531_p0, %p525_p11 }
  0x20   :  { %535 = shalt.err (!%p532_p1)
}
  0x21   :  { %41 = dma.hbm_to_vmem [thread:$0]  %s651_s3, 1024, %s36_s16, [#allocation5], %s541_s11, %s541_s11, %s542_s12  }
  0x22   :  { %536 = dma.done.wait [#allocation3], 1024  }
  0x23   :  { %537 = vsyncadd [#allocation3], 4294966272 }
  0x24   :  { %538 = dma.done.wait [#allocation5], 1024  }
  0x25   :  { %539 = vsyncadd [#allocation5], 4294966272  ;;  %v544_v0 = vmov 0.0   ;;  %vm545_vm0 = vmmov 0   ;;  %v471_v1 = vld [vmem:[%s649_s1] sm:$0xff]   ;;  %vm71_vm1 = vcmask 130048   ;;  %v341_v35 = vlaneseq }
  0x26   :  { %419 = vmatprep.subr.bf16.mxu0 %v544_v0  ;;  %421 = vmatprep.mubr.msk.bf16.mxu0 %vm545_vm0, %v544_v0  ;;  %v55_v2 = vld [vmem:[%s648_s0] sm:$0xf]  ;;  %v473_v4 = vld [vmem:[#allocation2 + $0x8] sm:$0xff]   ;;  %v474_v5 = vld [vmem:[#allocation2 + $0x10] sm:$0xff]  }
  0x27   :  { %425 = vmatprep.subr.bf16.mxu1 %v544_v0  ;;  %441 = vmatprep.mubr.msk.bf16.mxu1 %vm545_vm0, %v544_v0  ;;  %v472_v3 = vld [vmem:[#allocation2] sm:$0xff]   ;;  %v475_v6 = vld [vmem:[#allocation2 + $0x18] sm:$0xff]   ;;  %v477_v8 = vld [vmem:[#allocation2 + $0x28] sm:$0xff]   ;;  %v342_v36 = vand.u32 127, %v341_v35 }
  0x28   :  { %420 = vmatpush3.bf16.msra.mxu0 %v471_v1  ;;  %426 = vmatpush3.bf16.msra.mxu1 %v472_v3  ;;  %v476_v7 = vld [vmem:[#allocation2 + $0x20] sm:$0xff]   ;;  %v478_v9 = vld [vmem:[#allocation2 + $0x30] sm:$0xff]   ;;  %v479_v10 = vld [vmem:[#allocation2 + $0x38] sm:$0xff]  }
  0x29   :  { %445 = vmatprep.subr.bf16.mxu0 %v544_v0  ;;  %427 = vmatprep.subr.bf16.mxu1 %v544_v0  ;;  %v480_v11 = vld [vmem:[#allocation4] sm:$0xff]   ;;  %v481_v12 = vld [vmem:[#allocation4 + $0x8] sm:$0xff]   ;;  %v482_v13 = vld [vmem:[#allocation4 + $0x10] sm:$0xff]   ;;  %vm343_vm2 = vcmp.ge.s32.totalorder %v342_v36, 1  ;;  %vm344_vm3 = vcmp.lt.s32.totalorder %v342_v36, 7  ;;  %vm367_vm8 = vcmp.eq.s32.totalorder %v342_v36, 127 }
  0x2a   :  { %v483_v14 = vld [vmem:[#allocation4 + $0x18] sm:$0xff]   ;;  %v377_v15 = vld [vmem:[%s652_s4] ss:$0 sm:$0xff]  ;;  %v485_v24 = vld [vmem:[#allocation4 + $0x28] sm:$0xff]  }
  0x2b   :  { %422 = vmatmul.mubr.msk.bf16.vlgmr.msra.gmra.mrb[0].mxu0 %vm71_vm1, %v55_v2  ;;  %v484_v23 = vld [vmem:[#allocation4 + $0x20] sm:$0xff]   ;;  %v486_v25 = vld [vmem:[#allocation4 + $0x30] sm:$0xff]   ;;  %v487_v26 = vld [vmem:[#allocation4 + $0x38] sm:$0xff]  }
  0x2c   :  { %461 = vmatprep.mubr.msk.bf16.mxu0 %vm545_vm0, %v544_v0  ;;  %428 = vmatpush3.bf16.msra.mxu1 %v473_v4  ;;  %v380_v27 = vld [vmem:[%s653_s5] ss:$0 sm:$0xff]  ;;  %vm345_vm4 = vmand %vm343_vm2, %vm344_vm3 }
  0x2d   :  { %429 = vmatprep.subr.bf16.mxu1 %v544_v0  ;;  %446 = vmatpush3.bf16.msra.mxu0 %v480_v11  ;;  %v389_v37 = vld [vmem:[%s654_s6] ss:$0 sm:$0xff] }
  0x2e   :  { %447 = vmatprep.subr.bf16.mxu0 %v544_v0 }
  0x30   :  { %430 = vmatpush3.bf16.msra.mxu1 %v474_v5 }
  0x31   :  { %431 = vmatprep.subr.bf16.mxu1 %v544_v0  ;;  %448 = vmatpush3.bf16.msra.mxu0 %v481_v12 }
  0x32   :  { %449 = vmatprep.subr.bf16.mxu0 %v544_v0 }
  0x34   :  { %432 = vmatpush3.bf16.msra.mxu1 %v475_v6 }
  0x35   :  { %433 = vmatprep.subr.bf16.mxu1 %v544_v0  ;;  %450 = vmatpush3.bf16.msra.mxu0 %v482_v13 }
  0x36   :  { %451 = vmatprep.subr.bf16.mxu0 %v544_v0 }
  0x38   :  { %434 = vmatpush3.bf16.msra.mxu1 %v476_v7 }
  0x39   :  { %435 = vmatprep.subr.bf16.mxu1 %v544_v0  ;;  %452 = vmatpush3.bf16.msra.mxu0 %v483_v14 }
  0x3a   :  { %453 = vmatprep.subr.bf16.mxu0 %v544_v0 }
  0x3c   :  { %436 = vmatpush3.bf16.msra.mxu1 %v477_v8 }
  0x3d   :  { %437 = vmatprep.subr.bf16.mxu1 %v544_v0  ;;  %454 = vmatpush3.bf16.msra.mxu0 %v484_v23 }
  0x3e   :  { %455 = vmatprep.subr.bf16.mxu0 %v544_v0 }
  0x40   :  { %438 = vmatpush3.bf16.msra.mxu1 %v478_v9 }
  0x41   :  { %439 = vmatprep.subr.bf16.mxu1 %v544_v0  ;;  %456 = vmatpush3.bf16.msra.mxu0 %v485_v24 }
  0x42   :  { %457 = vmatprep.subr.bf16.mxu0 %v544_v0 }
  0x44   :  { %440 = vmatpush3.bf16.msra.mxu1 %v479_v10 }
  0x45   :  { %458 = vmatpush3.bf16.msra.mxu0 %v486_v25 }
  0x46   :  { %459 = vmatprep.subr.bf16.mxu0 %v544_v0 }
  0x49   :  { %460 = vmatpush3.bf16.msra.mxu0 %v487_v26 }
  0xfe   :  { %v109_v16 = vpop.f32.mrb[0].mxu0 }
  0xff   :  { %v110_v17 = vadd.f32 %v377_v15, %v109_v16  ;;  %v423_v18 = vpop.f32.mrb[1].mxu0 }
 0x100   :  { %v112_v19 = vpop.f32.mrb[2].mxu0 }
 0x101   :  { %488 = vtanh.f32 %v110_v17  ;;  %v424_v20 = vpop.f32.mrb[3].mxu0 }
 0x10b   :  { %v489_v21 = vpop.eup %488 }
 0x10c   :  { %v116_v22 = vpack.c.bf16 %v489_v21, %v489_v21 }
 0x10e   :  { %442 = vmatmul.mubr.bf16.vlgmr.msra.gmra.mrb[0].mxu1 %v116_v22 }
 0x1e1   :  { %v222_v28 = vpop.f32.mrb[0].mxu1 }
 0x1e2   :  { %v223_v29 = vadd.f32 %v380_v27, %v222_v28  ;;  %v443_v30 = vpop.f32.mrb[1].mxu1 }
 0x1e3   :  { %v225_v31 = vpop.f32.mrb[2].mxu1 }
 0x1e4   :  { %490 = vtanh.f32 %v223_v29  ;;  %v444_v32 = vpop.f32.mrb[3].mxu1 }
 0x1ee   :  { %v491_v33 = vpop.eup %490 }
 0x1ef   :  { %v229_v34 = vpack.c.bf16 %v491_v33, %v491_v33 }
 0x1f1   :  { %462 = vmatmul.mubr.bf16.vlgmr.msra.gmra.mrb[4].mxu0 %v229_v34 }
 0x2c4   :  { %v335_v38 = vpop.f32.mrb[4].mxu0 }
 0x2c5   :  { %v336_v39 = vadd.f32 %v389_v37, %v335_v38  ;;  %v463_v40 = vpop.f32.mrb[5].mxu0 }
 0x2c6   :  { %v338_v41 = vpop.f32.mrb[6].mxu0 }
 0x2c7   :  { %v464_v42 = vpop.f32.mrb[7].mxu0  ;;  %v346_v43 = vsel %vm345_vm4, %v336_v39, -inf }
 0x2c8   :  { %347 = vmax.xlane.f32.xlu0 %v346_v43 }
 0x355   :  { %v348_v44 = vpop.xlane.xlu0 %347 }
 0x356   :  { %vm349_vm5 = vcmp.eq.f32.partialorder %v346_v43, %v348_v44 }
 0x357   :  { %vm350_vm6 = vmand %vm345_vm4, %vm349_vm5 }
 0x358   :  { %v351_v45 = vsel %vm350_vm6, %v342_v36, 128 }
 0x359   :  { %v353_v46 = vshra.s32 %v351_v45, 16  ;;  %v352_v48 = vand.u32 65535, %v351_v45 }
 0x35b   :  { %v355_v47 = vcvt.s32.f32 %v353_v46  ;;  %v354_v50 = vcvt.s32.f32 %v352_v48 }
 0x35d   :  { %356 = vmin.xlane.f32.xlu0 %v355_v47 }
 0x3ea   :  { %v357_v49 = vpop.xlane.xlu0 %356 }
 0x3eb   :  { %vm358_vm7 = vcmp.eq.f32.partialorder %v355_v47, %v357_v49  ;;  %v363_v52 = vcvt.f32.s32 %v357_v49 }
 0x3ec   :  { %v359_v51 = vsel %vm358_vm7, %v354_v50, inf }
 0x3ed   :  { %360 = vmin.xlane.f32.xlu1 %v359_v51  ;;  %v364_v54 = vshll.u32 %v363_v52, 16 }
 0x47a   :  { %v361_v53 = vpop.xlane.xlu1 %360 }
 0x47b   :  { %v362_v55 = vcvt.f32.s32 %v361_v53 }
 0x47d   :  { %v365_v56 = vadd.s32 %v364_v54, %v362_v55 }
 0x47f   :  { %v398_v57 = vadd.s32 4294967295, %v365_v56 }
 0x481   :  { %v368_v58 = vcvt.s32.f32 %v398_v57 }
 0x483   :  { %v369_v59 = vsel %vm367_vm8, %v368_v58, %v336_v39 }
 0x484   :  { %370 = vst [vmem:[%s655_s7] sm:$0xff] %v369_v59 }
 0x485   :  { %375 = vsyncpa [#allocation3], 1 }
 0x486   :  { %376 = vsyncpa [#allocation5], 1 }

</bundles_post_ra>
